<compile_context>
chip_gen: v7x
topology: tpu7x:2x2x1
jax: 0.10.0
libtpu: 0.0.40
codegen_flags: <defaults>
</compile_context>

<pallas_src>
import functools
import math

import jax
import jax.numpy as jnp
from jax import lax
from jax.experimental import pallas as pl
from jax.experimental.pallas import tpu as pltpu


def encoder_layer_kernel(x_ref, mask_ref,
                         wq_ref, wk_ref, wv_ref,
                         bq_ref, bk_ref, bv_ref,
                         wo_ref, bo_ref,
                         g1_ref, beta1_ref,
                         w1_ref, b1_ref, w2_ref, b2_ref,
                         g2_ref, beta2_ref,
                         o_ref, *, heads, compute_dtype, ff_chunk):
    x = x_ref[0]            # (S, D) f32
    mask = mask_ref[0]      # (1, S) additive bias (0 or -1e9)
    S, D = x.shape
    dh = D // heads
    use_bf16 = compute_dtype == jnp.bfloat16

    xc = x.astype(compute_dtype)

    # --- full-width Q/K/V projections (lane-dense N = D, hoisted out of the
    #     head loop).  1/sqrt(dh) is already folded into wq / bq host-side. ---
    q = jnp.dot(xc, wq_ref[...], preferred_element_type=jnp.float32) + bq_ref[...]
    k = jnp.dot(xc, wk_ref[...], preferred_element_type=jnp.float32) + bk_ref[...]
    v = jnp.dot(xc, wv_ref[...], preferred_element_type=jnp.float32) + bv_ref[...]

    # --- per-head scaled-dot-product attention.  Projections are out of the
    #     loop, so each iteration only keeps one (S,S) score buffer live; the
    #     head outputs are concatenated and hit Wo with a single full-K matmul.
    heads_out = []
    for h in range(heads):  # static unroll; small trip count, static lane slices
        sl = slice(h * dh, (h + 1) * dh)
        qh = q[:, sl].astype(compute_dtype)
        kh = k[:, sl].astype(compute_dtype)
        vh = v[:, sl].astype(compute_dtype)

        # scores: contract last dims of q and k directly (no explicit transpose)
        s = lax.dot_general(qh, kh, (((1,), (1,)), ((), ())),
                            preferred_element_type=jnp.float32)           # (S, S)
        s = s + mask
        m = jnp.max(s, axis=-1, keepdims=True)
        p = jnp.exp(s - m)                                                # f32
        l = jnp.sum(p, axis=-1, keepdims=True)                            # (S, 1)

        pv = jnp.dot(p.astype(compute_dtype), vh,
                     preferred_element_type=jnp.float32)                  # (S, dh)
        # normalize AFTER the PV matmul: (S,1) reciprocal + (S,dh) multiply
        inv = pl.reciprocal(l, approx=use_bf16)
        heads_out.append(pv * inv)

    attn_cat = jnp.concatenate(heads_out, axis=-1)                        # (S, D)
    attn = jnp.dot(attn_cat.astype(compute_dtype), wo_ref[...],
                   preferred_element_type=jnp.float32) + bo_ref[...]

    # --- residual + LayerNorm 1 (dropout == identity in eval mode) ---
    h1 = x + attn
    mu1 = jnp.mean(h1, axis=-1, keepdims=True)
    var1 = jnp.mean(jnp.square(h1 - mu1), axis=-1, keepdims=True)
    h1n = (h1 - mu1) * lax.rsqrt(var1 + 1e-5) * g1_ref[...] + beta1_ref[...]

    # --- position-wise feed-forward ---
    F = w1_ref.shape[1]
    h1c = h1n.astype(compute_dtype)
    if ff_chunk >= F:
        z = jnp.dot(h1c, w1_ref[...], preferred_element_type=jnp.float32) + b1_ref[...]
        z = jnp.maximum(z, 0.0)
        ff = jnp.dot(z.astype(compute_dtype), w2_ref[...],
                     preferred_element_type=jnp.float32)
    else:
        ff = jnp.zeros((S, D), jnp.float32)
        for c0 in range(0, F, ff_chunk):  # static unroll, caps the (S,F) live buffer
            c1 = min(c0 + ff_chunk, F)
            z = (jnp.dot(h1c, w1_ref[:, c0:c1], preferred_element_type=jnp.float32)
                 + b1_ref[:, c0:c1])
            z = jnp.maximum(z, 0.0)
            ff = ff + jnp.dot(z.astype(compute_dtype), w2_ref[c0:c1, :],
                              preferred_element_type=jnp.float32)
    ff = ff + b2_ref[...]

    # --- residual + LayerNorm 2 ---
    h2 = h1n + ff
    mu2 = jnp.mean(h2, axis=-1, keepdims=True)
    var2 = jnp.mean(jnp.square(h2 - mu2), axis=-1, keepdims=True)
    out = (h2 - mu2) * lax.rsqrt(var2 + 1e-5) * g2_ref[...] + beta2_ref[...]

    o_ref[0] = out.astype(o_ref.dtype)


def encoder_layer(x, key_padding_mask, params, heads, compute_dtype=jnp.bfloat16):
    """x: (B, S, D) f32; key_padding_mask: (B, S) bool (True = pad) or None."""
    B, S, D = x.shape
    F = params["w1"].shape[1]
    dh = D // heads
    cd = compute_dtype
    scale = 1.0 / math.sqrt(dh)

    if key_padding_mask is None:
        mask_bias = jnp.zeros((B, 1, S), jnp.float32)
    else:
        mask_bias = jnp.where(key_padding_mask, -1e9, 0.0).astype(jnp.float32)
        mask_bias = mask_bias.reshape(B, 1, S)

    # Matmul weights cast to the compute dtype (bf16 MXU fast path on all
    # current generations); biases / LayerNorm params stay f32.  The attention
    # scale is folded into Wq / bq so no in-kernel scale multiply is needed.
    wq = (params["wq"] * scale).astype(cd)
    wk = params["wk"].astype(cd)
    wv = params["wv"].astype(cd)
    wo = params["wo"].astype(cd)
    bq = (params["bq"] * scale).reshape(1, D).astype(jnp.float32)
    bk = params["bk"].reshape(1, D)
    bv = params["bv"].reshape(1, D)
    bo = params["bo"].reshape(1, D)
    w1 = params["w1"].astype(cd)
    w2 = params["w2"].astype(cd)

    args = (
        x, mask_bias,
        wq, wk, wv, bq, bk, bv, wo, bo,
        params["ln1_g"].reshape(1, D), params["ln1_b"].reshape(1, D),
        w1, params["b1"].reshape(1, F),
        w2, params["b2"].reshape(1, D),
        params["ln2_g"].reshape(1, D), params["ln2_b"].reshape(1, D),
    )

    # Invariant operands go whole-array into VMEM: copied once, single-buffered.
    def vmem_spec():
        return pl.BlockSpec(memory_space=pltpu.MemorySpace.VMEM)

    in_specs = [
        pl.BlockSpec((1, S, D), lambda b: (b, 0, 0)),   # x      (pipelined)
        pl.BlockSpec((1, 1, S), lambda b: (b, 0, 0)),   # mask   (pipelined)
    ] + [vmem_spec() for _ in range(len(args) - 2)]

    # FFN chunking only when the (S, F) intermediate would be large.
    ff_chunk = F if S * F * 4 <= (8 << 20) else 2048

    # vmem_limit from a computed footprint (+2x headroom), clamped to ~85% of
    # this generation's physical VMEM (v7x has only 64 MiB per TensorCore).
    try:
        vmem_cap = int(pltpu.get_tpu_info().vmem_capacity_bytes)
    except Exception:
        vmem_cap = 64 * 2**20  # conservative (v7x) fallback
    weight_bytes = sum(int(a.size) * a.dtype.itemsize for a in args[2:])
    block_bytes = 2 * (S * D * 4 + S * 4 + S * D * 4)       # double-buffered x/mask/out
    cw = min(F, ff_chunk)
    inter_bytes = (4 * 2 * S * S        # f32 scores s and probs p co-live
                   + 2 * S * S          # bf16 copy of p for the PV matmul
                   + 4 * 5 * S * D      # f32 q, k, v, concat head output, h1/h1n
                   + (4 + 2) * S * cw)  # f32 ReLU intermediate + bf16 copy
    vmem_limit = int(min(0.85 * vmem_cap,
                         max(32 * 2**20, 2 * (weight_bytes + block_bytes + inter_bytes))))

    return pl.pallas_call(
        functools.partial(encoder_layer_kernel, heads=heads,
                          compute_dtype=cd, ff_chunk=ff_chunk),
        out_shape=jax.ShapeDtypeStruct((B, S, D), jnp.float32),
        grid=(B,),
        in_specs=in_specs,
        out_specs=pl.BlockSpec((1, S, D), lambda b: (b, 0, 0)),
        compiler_params=pltpu.CompilerParams(
            dimension_semantics=("parallel",),   # batch steps are independent
            vmem_limit_bytes=vmem_limit),
    )(*args)


def reference_encoder_layer(x, key_padding_mask, params, heads):
    """Pure-JAX reference for validation."""
    B, S, D = x.shape
    dh = D // heads
    scale = 1.0 / math.sqrt(dh)

    def proj(a, w, b):
        return jnp.einsum("bsd,de->bse", a, w) + b

    q = proj(x, params["wq"], params["bq"]).reshape(B, S, heads, dh)
    k = proj(x, params["wk"], params["bk"]).reshape(B, S, heads, dh)
    v = proj(x, params["wv"], params["bv"]).reshape(B, S, heads, dh)
    scores = jnp.einsum("bqhd,bkhd->bhqk", q, k) * scale
    if key_padding_mask is not None:
        scores = scores + jnp.where(key_padding_mask, -1e9, 0.0)[:, None, None, :]
    p = jax.nn.softmax(scores, axis=-1)
    attn = jnp.einsum("bhqk,bkhd->bqhd", p, v).reshape(B, S, D)
    attn = jnp.einsum("bsd,de->bse", attn, params["wo"]) + params["bo"]

    def ln(a, g, b):
        mu = jnp.mean(a, -1, keepdims=True)
        var = jnp.mean((a - mu) ** 2, -1, keepdims=True)
        return (a - mu) * jax.lax.rsqrt(var + 1e-5) * g + b

    h1 = ln(x + attn, params["ln1_g"], params["ln1_b"])
    ff = jnp.maximum(jnp.einsum("bsd,df->bsf", h1, params["w1"]) + params["b1"], 0.0)
    ff = jnp.einsum("bsf,fd->bsd", ff, params["w2"]) + params["b2"]
    return ln(h1 + ff, params["ln2_g"], params["ln2_b"])


def init_params(key, d_model, d_fc):
    keys = jax.random.split(key, 8)
    s = 1.0 / math.sqrt(d_model)
    sf = 1.0 / math.sqrt(d_fc)
    return {
        "wq": jax.random.uniform(keys[0], (d_model, d_model), jnp.float32, -s, s),
        "bq": jnp.zeros((d_model,), jnp.float32),
        "wk": jax.random.uniform(keys[1], (d_model, d_model), jnp.float32, -s, s),
        "bk": jnp.zeros((d_model,), jnp.float32),
        "wv": jax.random.uniform(keys[2], (d_model, d_model), jnp.float32, -s, s),
        "bv": jnp.zeros((d_model,), jnp.float32),
        "wo": jax.random.uniform(keys[3], (d_model, d_model), jnp.float32, -s, s),
        "bo": jax.random.uniform(keys[4], (d_model,), jnp.float32, -s, s),
        "ln1_g": jnp.ones((d_model,), jnp.float32),
        "ln1_b": jnp.zeros((d_model,), jnp.float32),
        "w1": jax.random.uniform(keys[5], (d_model, d_fc), jnp.float32, -s, s),
        "b1": jax.random.uniform(keys[6], (d_fc,), jnp.float32, -s, s),
        "w2": jax.random.uniform(keys[7], (d_fc, d_model), jnp.float32, -sf, sf),
        "b2": jnp.zeros((d_model,), jnp.float32),
        "ln2_g": jnp.ones((d_model,), jnp.float32),
        "ln2_b": jnp.zeros((d_model,), jnp.float32),
    }


if __name__ == "__main__":
    B, S, D, H, F = 2, 8, 32, 4, 64

    key = jax.random.PRNGKey(0)
    kx, kp = jax.random.split(key, 2)
    x = jax.random.normal(kx, (B, S, D), jnp.float32)
    params = init_params(kp, D, F)
    # mask out the last two positions of batch element 1 (True = ignore/pad)
    key_padding_mask = jnp.zeros((B, S), jnp.bool_).at[1, -2:].set(True)

    ref = reference_encoder_layer(x, key_padding_mask, params, H)

    # f32 MXU-operand path: tight check against the f32 reference.
    out_f32 = jax.block_until_ready(
        encoder_layer(x, key_padding_mask, params, H, compute_dtype=jnp.float32))
    assert out_f32.shape == (B, S, D)
    assert jnp.allclose(out_f32, ref, atol=1e-4, rtol=1e-4), "f32 path mismatch"

    # bf16 MXU-operand default (f32 accumulate, f32 softmax/LayerNorm): looser check.
    out_bf16 = jax.block_until_ready(
        encoder_layer(x, key_padding_mask, params, H))
    assert out_bf16.shape == (B, S, D)
    assert jnp.allclose(out_bf16, ref, atol=5e-2, rtol=5e-2), "bf16 path mismatch"

    print("KERNEL_OK")
</pallas_src>

<mosaic_0001>
module attributes {stable_mosaic.version = 11 : i64} {
  func.func @encoder_layer_kernel(%arg0: i32, %arg1: memref<1x8x32xf32, #tpu.memory_space<vmem>>, %arg2: memref<1x1x8xf32, #tpu.memory_space<vmem>>, %arg3: memref<32x32xf32, #tpu.memory_space<vmem>>, %arg4: memref<32x32xf32, #tpu.memory_space<vmem>>, %arg5: memref<32x32xf32, #tpu.memory_space<vmem>>, %arg6: memref<1x32xf32, #tpu.memory_space<vmem>>, %arg7: memref<1x32xf32, #tpu.memory_space<vmem>>, %arg8: memref<1x32xf32, #tpu.memory_space<vmem>>, %arg9: memref<32x32xf32, #tpu.memory_space<vmem>>, %arg10: memref<1x32xf32, #tpu.memory_space<vmem>>, %arg11: memref<1x32xf32, #tpu.memory_space<vmem>>, %arg12: memref<1x32xf32, #tpu.memory_space<vmem>>, %arg13: memref<32x64xf32, #tpu.memory_space<vmem>>, %arg14: memref<1x64xf32, #tpu.memory_space<vmem>>, %arg15: memref<64x32xf32, #tpu.memory_space<vmem>>, %arg16: memref<1x32xf32, #tpu.memory_space<vmem>>, %arg17: memref<1x32xf32, #tpu.memory_space<vmem>>, %arg18: memref<1x32xf32, #tpu.memory_space<vmem>>, %arg19: memref<1x8x32xf32, #tpu.memory_space<vmem>>) attributes {dimension_semantics = [#tpu.dimension_semantics<parallel>], iteration_bounds = array<i64: 2>, scalar_prefetch = 0 : i64, scratch_operands = 0 : i64, tpu.core_type = #tpu.core_type<tc>, window_params = [{transform_indices = @transform_0, window_bounds = array<i64: 1, 8, 32>}, {transform_indices = @transform_1, window_bounds = array<i64: 1, 1, 8>}, {pipeline_mode = #tpu.pipeline_mode<synchronous>, transform_indices = @transform_2, window_bounds = array<i64: 32, 32>}, {pipeline_mode = #tpu.pipeline_mode<synchronous>, transform_indices = @transform_3, window_bounds = array<i64: 32, 32>}, {pipeline_mode = #tpu.pipeline_mode<synchronous>, transform_indices = @transform_4, window_bounds = array<i64: 32, 32>}, {pipeline_mode = #tpu.pipeline_mode<synchronous>, transform_indices = @transform_5, window_bounds = array<i64: 1, 32>}, {pipeline_mode = #tpu.pipeline_mode<synchronous>, transform_indices = @transform_6, window_bounds = array<i64: 1, 32>}, {pipeline_mode = #tpu.pipeline_mode<synchronous>, transform_indices = @transform_7, window_bounds = array<i64: 1, 32>}, {pipeline_mode = #tpu.pipeline_mode<synchronous>, transform_indices = @transform_8, window_bounds = array<i64: 32, 32>}, {pipeline_mode = #tpu.pipeline_mode<synchronous>, transform_indices = @transform_9, window_bounds = array<i64: 1, 32>}, {pipeline_mode = #tpu.pipeline_mode<synchronous>, transform_indices = @transform_10, window_bounds = array<i64: 1, 32>}, {pipeline_mode = #tpu.pipeline_mode<synchronous>, transform_indices = @transform_11, window_bounds = array<i64: 1, 32>}, {pipeline_mode = #tpu.pipeline_mode<synchronous>, transform_indices = @transform_12, window_bounds = array<i64: 32, 64>}, {pipeline_mode = #tpu.pipeline_mode<synchronous>, transform_indices = @transform_13, window_bounds = array<i64: 1, 64>}, {pipeline_mode = #tpu.pipeline_mode<synchronous>, transform_indices = @transform_14, window_bounds = array<i64: 64, 32>}, {pipeline_mode = #tpu.pipeline_mode<synchronous>, transform_indices = @transform_15, window_bounds = array<i64: 1, 32>}, {pipeline_mode = #tpu.pipeline_mode<synchronous>, transform_indices = @transform_16, window_bounds = array<i64: 1, 32>}, {pipeline_mode = #tpu.pipeline_mode<synchronous>, transform_indices = @transform_17, window_bounds = array<i64: 1, 32>}, {transform_indices = @transform_18, window_bounds = array<i64: 1, 8, 32>}]} {
    %c0 = arith.constant 0 : index
    %c0_0 = arith.constant 0 : index
    %c0_1 = arith.constant 0 : index
    %0 = vector.load %arg1[%c0, %c0_0, %c0_1] : memref<1x8x32xf32, #tpu.memory_space<vmem>>, vector<1x8x32xf32>
    %1 = vector.shape_cast %0 : vector<1x8x32xf32> to vector<8x32xf32>
    %c0_2 = arith.constant 0 : index
    %c0_3 = arith.constant 0 : index
    %c0_4 = arith.constant 0 : index
    %2 = vector.load %arg2[%c0_2, %c0_3, %c0_4] : memref<1x1x8xf32, #tpu.memory_space<vmem>>, vector<1x1x8xf32>
    %3 = vector.shape_cast %2 : vector<1x1x8xf32> to vector<1x8xf32>
    %c0_5 = arith.constant 0 : index
    %c0_6 = arith.constant 0 : index
    %4 = vector.load %arg3[%c0_5, %c0_6] : memref<32x32xf32, #tpu.memory_space<vmem>>, vector<32x32xf32>
    %cst = arith.constant dense<0.000000e+00> : vector<8x32xf32>
    %5 = tpu.matmul %1, %4, %cst {dimension_numbers = #tpu.dot_dimension_numbers<[1], [0], [0], [1], [0, 0, 1, 1], [], []>} : vector<8x32xf32>, vector<32x32xf32>, vector<8x32xf32> -> vector<8x32xf32>
    %c0_7 = arith.constant 0 : index
    %c0_8 = arith.constant 0 : index
    %6 = vector.load %arg6[%c0_7, %c0_8] : memref<1x32xf32, #tpu.memory_space<vmem>>, vector<1x32xf32>
    %7 = vector.broadcast %6 : vector<1x32xf32> to vector<8x32xf32>
    %8 = arith.addf %5, %7 : vector<8x32xf32>
    %c0_9 = arith.constant 0 : index
    %c0_10 = arith.constant 0 : index
    %9 = vector.load %arg4[%c0_9, %c0_10] : memref<32x32xf32, #tpu.memory_space<vmem>>, vector<32x32xf32>
    %cst_11 = arith.constant dense<0.000000e+00> : vector<8x32xf32>
    %10 = tpu.matmul %1, %9, %cst_11 {dimension_numbers = #tpu.dot_dimension_numbers<[1], [0], [0], [1], [0, 0, 1, 1], [], []>} : vector<8x32xf32>, vector<32x32xf32>, vector<8x32xf32> -> vector<8x32xf32>
    %c0_12 = arith.constant 0 : index
    %c0_13 = arith.constant 0 : index
    %11 = vector.load %arg7[%c0_12, %c0_13] : memref<1x32xf32, #tpu.memory_space<vmem>>, vector<1x32xf32>
    %12 = vector.broadcast %11 : vector<1x32xf32> to vector<8x32xf32>
    %13 = arith.addf %10, %12 : vector<8x32xf32>
    %c0_14 = arith.constant 0 : index
    %c0_15 = arith.constant 0 : index
    %14 = vector.load %arg5[%c0_14, %c0_15] : memref<32x32xf32, #tpu.memory_space<vmem>>, vector<32x32xf32>
    %cst_16 = arith.constant dense<0.000000e+00> : vector<8x32xf32>
    %15 = tpu.matmul %1, %14, %cst_16 {dimension_numbers = #tpu.dot_dimension_numbers<[1], [0], [0], [1], [0, 0, 1, 1], [], []>} : vector<8x32xf32>, vector<32x32xf32>, vector<8x32xf32> -> vector<8x32xf32>
    %c0_17 = arith.constant 0 : index
    %c0_18 = arith.constant 0 : index
    %16 = vector.load %arg8[%c0_17, %c0_18] : memref<1x32xf32, #tpu.memory_space<vmem>>, vector<1x32xf32>
    %17 = vector.broadcast %16 : vector<1x32xf32> to vector<8x32xf32>
    %18 = arith.addf %15, %17 : vector<8x32xf32>
    %19 = vector.extract_strided_slice %8 {offsets = [0, 0], sizes = [8, 8], strides = [1, 1]} : vector<8x32xf32> to vector<8x8xf32>
    %20 = vector.extract_strided_slice %13 {offsets = [0, 0], sizes = [8, 8], strides = [1, 1]} : vector<8x32xf32> to vector<8x8xf32>
    %21 = vector.extract_strided_slice %18 {offsets = [0, 0], sizes = [8, 8], strides = [1, 1]} : vector<8x32xf32> to vector<8x8xf32>
    %cst_19 = arith.constant dense<0.000000e+00> : vector<8x8xf32>
    %22 = tpu.matmul %19, %20, %cst_19 {dimension_numbers = #tpu.dot_dimension_numbers<[1], [1], [0], [0], [0, 0, 1, 0], [], []>} : vector<8x8xf32>, vector<8x8xf32>, vector<8x8xf32> -> vector<8x8xf32>
    %23 = vector.broadcast %3 : vector<1x8xf32> to vector<8x8xf32>
    %24 = arith.addf %22, %23 : vector<8x8xf32>
    %cst_20 = arith.constant dense<0xFF800000> : vector<8xf32>
    %25 = vector.multi_reduction <maximumf>, %24, %cst_20 [1] : vector<8x8xf32> to vector<8xf32>
    %26 = vector.shape_cast %25 : vector<8xf32> to vector<8x1xf32>
    %27 = vector.broadcast %26 : vector<8x1xf32> to vector<8x8xf32>
    %28 = arith.subf %24, %27 : vector<8x8xf32>
    %29 = math.exp %28 : vector<8x8xf32>
    %cst_21 = arith.constant dense<0.000000e+00> : vector<8xf32>
    %30 = vector.multi_reduction <add>, %29, %cst_21 [1] : vector<8x8xf32> to vector<8xf32>
    %31 = vector.shape_cast %30 : vector<8xf32> to vector<8x1xf32>
    %cst_22 = arith.constant dense<0.000000e+00> : vector<8x8xf32>
    %32 = tpu.matmul %29, %21, %cst_22 {dimension_numbers = #tpu.dot_dimension_numbers<[1], [0], [0], [1], [0, 0, 1, 1], [], []>} : vector<8x8xf32>, vector<8x8xf32>, vector<8x8xf32> -> vector<8x8xf32>
    %33 = tpu.reciprocal %31 : vector<8x1xf32> -> vector<8x1xf32>
    %34 = vector.broadcast %33 : vector<8x1xf32> to vector<8x8xf32>
    %35 = arith.mulf %32, %34 : vector<8x8xf32>
    %36 = vector.extract_strided_slice %8 {offsets = [0, 8], sizes = [8, 8], strides = [1, 1]} : vector<8x32xf32> to vector<8x8xf32>
    %37 = vector.extract_strided_slice %13 {offsets = [0, 8], sizes = [8, 8], strides = [1, 1]} : vector<8x32xf32> to vector<8x8xf32>
    %38 = vector.extract_strided_slice %18 {offsets = [0, 8], sizes = [8, 8], strides = [1, 1]} : vector<8x32xf32> to vector<8x8xf32>
    %cst_23 = arith.constant dense<0.000000e+00> : vector<8x8xf32>
    %39 = tpu.matmul %36, %37, %cst_23 {dimension_numbers = #tpu.dot_dimension_numbers<[1], [1], [0], [0], [0, 0, 1, 0], [], []>} : vector<8x8xf32>, vector<8x8xf32>, vector<8x8xf32> -> vector<8x8xf32>
    %40 = vector.broadcast %3 : vector<1x8xf32> to vector<8x8xf32>
    %41 = arith.addf %39, %40 : vector<8x8xf32>
    %cst_24 = arith.constant dense<0xFF800000> : vector<8xf32>
    %42 = vector.multi_reduction <maximumf>, %41, %cst_24 [1] : vector<8x8xf32> to vector<8xf32>
    %43 = vector.shape_cast %42 : vector<8xf32> to vector<8x1xf32>
    %44 = vector.broadcast %43 : vector<8x1xf32> to vector<8x8xf32>
    %45 = arith.subf %41, %44 : vector<8x8xf32>
    %46 = math.exp %45 : vector<8x8xf32>
    %cst_25 = arith.constant dense<0.000000e+00> : vector<8xf32>
    %47 = vector.multi_reduction <add>, %46, %cst_25 [1] : vector<8x8xf32> to vector<8xf32>
    %48 = vector.shape_cast %47 : vector<8xf32> to vector<8x1xf32>
    %cst_26 = arith.constant dense<0.000000e+00> : vector<8x8xf32>
    %49 = tpu.matmul %46, %38, %cst_26 {dimension_numbers = #tpu.dot_dimension_numbers<[1], [0], [0], [1], [0, 0, 1, 1], [], []>} : vector<8x8xf32>, vector<8x8xf32>, vector<8x8xf32> -> vector<8x8xf32>
    %50 = tpu.reciprocal %48 : vector<8x1xf32> -> vector<8x1xf32>
    %51 = vector.broadcast %50 : vector<8x1xf32> to vector<8x8xf32>
    %52 = arith.mulf %49, %51 : vector<8x8xf32>
    %53 = vector.extract_strided_slice %8 {offsets = [0, 16], sizes = [8, 8], strides = [1, 1]} : vector<8x32xf32> to vector<8x8xf32>
    %54 = vector.extract_strided_slice %13 {offsets = [0, 16], sizes = [8, 8], strides = [1, 1]} : vector<8x32xf32> to vector<8x8xf32>
    %55 = vector.extract_strided_slice %18 {offsets = [0, 16], sizes = [8, 8], strides = [1, 1]} : vector<8x32xf32> to vector<8x8xf32>
    %cst_27 = arith.constant dense<0.000000e+00> : vector<8x8xf32>
    %56 = tpu.matmul %53, %54, %cst_27 {dimension_numbers = #tpu.dot_dimension_numbers<[1], [1], [0], [0], [0, 0, 1, 0], [], []>} : vector<8x8xf32>, vector<8x8xf32>, vector<8x8xf32> -> vector<8x8xf32>
    %57 = vector.broadcast %3 : vector<1x8xf32> to vector<8x8xf32>
    %58 = arith.addf %56, %57 : vector<8x8xf32>
    %cst_28 = arith.constant dense<0xFF800000> : vector<8xf32>
    %59 = vector.multi_reduction <maximumf>, %58, %cst_28 [1] : vector<8x8xf32> to vector<8xf32>
    %60 = vector.shape_cast %59 : vector<8xf32> to vector<8x1xf32>
    %61 = vector.broadcast %60 : vector<8x1xf32> to vector<8x8xf32>
    %62 = arith.subf %58, %61 : vector<8x8xf32>
    %63 = math.exp %62 : vector<8x8xf32>
    %cst_29 = arith.constant dense<0.000000e+00> : vector<8xf32>
    %64 = vector.multi_reduction <add>, %63, %cst_29 [1] : vector<8x8xf32> to vector<8xf32>
    %65 = vector.shape_cast %64 : vector<8xf32> to vector<8x1xf32>
    %cst_30 = arith.constant dense<0.000000e+00> : vector<8x8xf32>
    %66 = tpu.matmul %63, %55, %cst_30 {dimension_numbers = #tpu.dot_dimension_numbers<[1], [0], [0], [1], [0, 0, 1, 1], [], []>} : vector<8x8xf32>, vector<8x8xf32>, vector<8x8xf32> -> vector<8x8xf32>
    %67 = tpu.reciprocal %65 : vector<8x1xf32> -> vector<8x1xf32>
    %68 = vector.broadcast %67 : vector<8x1xf32> to vector<8x8xf32>
    %69 = arith.mulf %66, %68 : vector<8x8xf32>
    %70 = vector.extract_strided_slice %8 {offsets = [0, 24], sizes = [8, 8], strides = [1, 1]} : vector<8x32xf32> to vector<8x8xf32>
    %71 = vector.extract_strided_slice %13 {offsets = [0, 24], sizes = [8, 8], strides = [1, 1]} : vector<8x32xf32> to vector<8x8xf32>
    %72 = vector.extract_strided_slice %18 {offsets = [0, 24], sizes = [8, 8], strides = [1, 1]} : vector<8x32xf32> to vector<8x8xf32>
    %cst_31 = arith.constant dense<0.000000e+00> : vector<8x8xf32>
    %73 = tpu.matmul %70, %71, %cst_31 {dimension_numbers = #tpu.dot_dimension_numbers<[1], [1], [0], [0], [0, 0, 1, 0], [], []>} : vector<8x8xf32>, vector<8x8xf32>, vector<8x8xf32> -> vector<8x8xf32>
    %74 = vector.broadcast %3 : vector<1x8xf32> to vector<8x8xf32>
    %75 = arith.addf %73, %74 : vector<8x8xf32>
    %cst_32 = arith.constant dense<0xFF800000> : vector<8xf32>
    %76 = vector.multi_reduction <maximumf>, %75, %cst_32 [1] : vector<8x8xf32> to vector<8xf32>
    %77 = vector.shape_cast %76 : vector<8xf32> to vector<8x1xf32>
    %78 = vector.broadcast %77 : vector<8x1xf32> to vector<8x8xf32>
    %79 = arith.subf %75, %78 : vector<8x8xf32>
    %80 = math.exp %79 : vector<8x8xf32>
    %cst_33 = arith.constant dense<0.000000e+00> : vector<8xf32>
    %81 = vector.multi_reduction <add>, %80, %cst_33 [1] : vector<8x8xf32> to vector<8xf32>
    %82 = vector.shape_cast %81 : vector<8xf32> to vector<8x1xf32>
    %cst_34 = arith.constant dense<0.000000e+00> : vector<8x8xf32>
    %83 = tpu.matmul %80, %72, %cst_34 {dimension_numbers = #tpu.dot_dimension_numbers<[1], [0], [0], [1], [0, 0, 1, 1], [], []>} : vector<8x8xf32>, vector<8x8xf32>, vector<8x8xf32> -> vector<8x8xf32>
    %84 = tpu.reciprocal %82 : vector<8x1xf32> -> vector<8x1xf32>
    %85 = vector.broadcast %84 : vector<8x1xf32> to vector<8x8xf32>
    %86 = arith.mulf %83, %85 : vector<8x8xf32>
    %87 = tpu.concatenate %35, %52, %69, %86 in 1 : vector<8x8xf32>, vector<8x8xf32>, vector<8x8xf32>, vector<8x8xf32> -> vector<8x32xf32>
    %c0_35 = arith.constant 0 : index
    %c0_36 = arith.constant 0 : index
    %88 = vector.load %arg9[%c0_35, %c0_36] : memref<32x32xf32, #tpu.memory_space<vmem>>, vector<32x32xf32>
    %cst_37 = arith.constant dense<0.000000e+00> : vector<8x32xf32>
    %89 = tpu.matmul %87, %88, %cst_37 {dimension_numbers = #tpu.dot_dimension_numbers<[1], [0], [0], [1], [0, 0, 1, 1], [], []>} : vector<8x32xf32>, vector<32x32xf32>, vector<8x32xf32> -> vector<8x32xf32>
    %c0_38 = arith.constant 0 : index
    %c0_39 = arith.constant 0 : index
    %90 = vector.load %arg10[%c0_38, %c0_39] : memref<1x32xf32, #tpu.memory_space<vmem>>, vector<1x32xf32>
    %91 = vector.broadcast %90 : vector<1x32xf32> to vector<8x32xf32>
    %92 = arith.addf %89, %91 : vector<8x32xf32>
    %93 = arith.addf %1, %92 : vector<8x32xf32>
    %cst_40 = arith.constant dense<0.000000e+00> : vector<8xf32>
    %94 = vector.multi_reduction <add>, %93, %cst_40 [1] : vector<8x32xf32> to vector<8xf32>
    %95 = vector.shape_cast %94 : vector<8xf32> to vector<8x1xf32>
    %cst_41 = arith.constant 3.200000e+01 : f32
    %96 = vector.broadcast %cst_41 : f32 to vector<8x1xf32>
    %97 = arith.divf %95, %96 : vector<8x1xf32>
    %98 = vector.broadcast %97 : vector<8x1xf32> to vector<8x32xf32>
    %99 = arith.subf %93, %98 : vector<8x32xf32>
    %100 = arith.mulf %99, %99 : vector<8x32xf32>
    %cst_42 = arith.constant dense<0.000000e+00> : vector<8xf32>
    %101 = vector.multi_reduction <add>, %100, %cst_42 [1] : vector<8x32xf32> to vector<8xf32>
    %102 = vector.shape_cast %101 : vector<8xf32> to vector<8x1xf32>
    %cst_43 = arith.constant 3.200000e+01 : f32
    %103 = vector.broadcast %cst_43 : f32 to vector<8x1xf32>
    %104 = arith.divf %102, %103 : vector<8x1xf32>
    %105 = vector.broadcast %97 : vector<8x1xf32> to vector<8x32xf32>
    %106 = arith.subf %93, %105 : vector<8x32xf32>
    %cst_44 = arith.constant 9.99999974E-6 : f32
    %107 = vector.broadcast %cst_44 : f32 to vector<8x1xf32>
    %108 = arith.addf %104, %107 : vector<8x1xf32>
    %109 = math.rsqrt %108 : vector<8x1xf32>
    %110 = vector.broadcast %109 : vector<8x1xf32> to vector<8x32xf32>
    %111 = arith.mulf %106, %110 : vector<8x32xf32>
    %c0_45 = arith.constant 0 : index
    %c0_46 = arith.constant 0 : index
    %112 = vector.load %arg11[%c0_45, %c0_46] : memref<1x32xf32, #tpu.memory_space<vmem>>, vector<1x32xf32>
    %113 = vector.broadcast %112 : vector<1x32xf32> to vector<8x32xf32>
    %114 = arith.mulf %111, %113 : vector<8x32xf32>
    %c0_47 = arith.constant 0 : index
    %c0_48 = arith.constant 0 : index
    %115 = vector.load %arg12[%c0_47, %c0_48] : memref<1x32xf32, #tpu.memory_space<vmem>>, vector<1x32xf32>
    %116 = vector.broadcast %115 : vector<1x32xf32> to vector<8x32xf32>
    %117 = arith.addf %114, %116 : vector<8x32xf32>
    %c0_49 = arith.constant 0 : index
    %c0_50 = arith.constant 0 : index
    %118 = vector.load %arg13[%c0_49, %c0_50] : memref<32x64xf32, #tpu.memory_space<vmem>>, vector<32x64xf32>
    %cst_51 = arith.constant dense<0.000000e+00> : vector<8x64xf32>
    %119 = tpu.matmul %117, %118, %cst_51 {dimension_numbers = #tpu.dot_dimension_numbers<[1], [0], [0], [1], [0, 0, 1, 1], [], []>} : vector<8x32xf32>, vector<32x64xf32>, vector<8x64xf32> -> vector<8x64xf32>
    %c0_52 = arith.constant 0 : index
    %c0_53 = arith.constant 0 : index
    %120 = vector.load %arg14[%c0_52, %c0_53] : memref<1x64xf32, #tpu.memory_space<vmem>>, vector<1x64xf32>
    %121 = vector.broadcast %120 : vector<1x64xf32> to vector<8x64xf32>
    %122 = arith.addf %119, %121 : vector<8x64xf32>
    %cst_54 = arith.constant 0.000000e+00 : f32
    %123 = vector.broadcast %cst_54 : f32 to vector<8x64xf32>
    %124 = arith.maximumf %122, %123 : vector<8x64xf32>
    %c0_55 = arith.constant 0 : index
    %c0_56 = arith.constant 0 : index
    %125 = vector.load %arg15[%c0_55, %c0_56] : memref<64x32xf32, #tpu.memory_space<vmem>>, vector<64x32xf32>
    %cst_57 = arith.constant dense<0.000000e+00> : vector<8x32xf32>
    %126 = tpu.matmul %124, %125, %cst_57 {dimension_numbers = #tpu.dot_dimension_numbers<[1], [0], [0], [1], [0, 0, 1, 1], [], []>} : vector<8x64xf32>, vector<64x32xf32>, vector<8x32xf32> -> vector<8x32xf32>
    %c0_58 = arith.constant 0 : index
    %c0_59 = arith.constant 0 : index
    %127 = vector.load %arg16[%c0_58, %c0_59] : memref<1x32xf32, #tpu.memory_space<vmem>>, vector<1x32xf32>
    %128 = vector.broadcast %127 : vector<1x32xf32> to vector<8x32xf32>
    %129 = arith.addf %126, %128 : vector<8x32xf32>
    %130 = arith.addf %117, %129 : vector<8x32xf32>
    %cst_60 = arith.constant dense<0.000000e+00> : vector<8xf32>
    %131 = vector.multi_reduction <add>, %130, %cst_60 [1] : vector<8x32xf32> to vector<8xf32>
    %132 = vector.shape_cast %131 : vector<8xf32> to vector<8x1xf32>
    %cst_61 = arith.constant 3.200000e+01 : f32
    %133 = vector.broadcast %cst_61 : f32 to vector<8x1xf32>
    %134 = arith.divf %132, %133 : vector<8x1xf32>
    %135 = vector.broadcast %134 : vector<8x1xf32> to vector<8x32xf32>
    %136 = arith.subf %130, %135 : vector<8x32xf32>
    %137 = arith.mulf %136, %136 : vector<8x32xf32>
    %cst_62 = arith.constant dense<0.000000e+00> : vector<8xf32>
    %138 = vector.multi_reduction <add>, %137, %cst_62 [1] : vector<8x32xf32> to vector<8xf32>
    %139 = vector.shape_cast %138 : vector<8xf32> to vector<8x1xf32>
    %cst_63 = arith.constant 3.200000e+01 : f32
    %140 = vector.broadcast %cst_63 : f32 to vector<8x1xf32>
    %141 = arith.divf %139, %140 : vector<8x1xf32>
    %142 = vector.broadcast %134 : vector<8x1xf32> to vector<8x32xf32>
    %143 = arith.subf %130, %142 : vector<8x32xf32>
    %cst_64 = arith.constant 9.99999974E-6 : f32
    %144 = vector.broadcast %cst_64 : f32 to vector<8x1xf32>
    %145 = arith.addf %141, %144 : vector<8x1xf32>
    %146 = math.rsqrt %145 : vector<8x1xf32>
    %147 = vector.broadcast %146 : vector<8x1xf32> to vector<8x32xf32>
    %148 = arith.mulf %143, %147 : vector<8x32xf32>
    %c0_65 = arith.constant 0 : index
    %c0_66 = arith.constant 0 : index
    %149 = vector.load %arg17[%c0_65, %c0_66] : memref<1x32xf32, #tpu.memory_space<vmem>>, vector<1x32xf32>
    %150 = vector.broadcast %149 : vector<1x32xf32> to vector<8x32xf32>
    %151 = arith.mulf %148, %150 : vector<8x32xf32>
    %c0_67 = arith.constant 0 : index
    %c0_68 = arith.constant 0 : index
    %152 = vector.load %arg18[%c0_67, %c0_68] : memref<1x32xf32, #tpu.memory_space<vmem>>, vector<1x32xf32>
    %153 = vector.broadcast %152 : vector<1x32xf32> to vector<8x32xf32>
    %154 = arith.addf %151, %153 : vector<8x32xf32>
    %c0_69 = arith.constant 0 : index
    %c0_70 = arith.constant 0 : index
    %c0_71 = arith.constant 0 : index
    %155 = vector.load %arg19[%c0_69, %c0_70, %c0_71] : memref<1x8x32xf32, #tpu.memory_space<vmem>>, vector<1x8x32xf32>
    %156 = vector.shape_cast %155 : vector<1x8x32xf32> to vector<8x32xf32>
    %157 = vector.shape_cast %154 : vector<8x32xf32> to vector<1x8x32xf32>
    tpu.vector_store %arg19[%c0_69, %c0_70, %c0_71], %157 {strides = array<i32>} : memref<1x8x32xf32, #tpu.memory_space<vmem>>, vector<1x8x32xf32>,
    return
  }
  func.func @transform_0(%arg0: i32) -> (i32, i32, i32) {
    %c0_i32 = arith.constant 0 : i32
    %c0_i32_0 = arith.constant 0 : i32
    %c0_i32_1 = arith.constant 0 : i32
    return %arg0, %c0_i32, %c0_i32_0 : i32, i32, i32
  }
  func.func @transform_1(%arg0: i32) -> (i32, i32, i32) {
    %c0_i32 = arith.constant 0 : i32
    %c0_i32_0 = arith.constant 0 : i32
    %c0_i32_1 = arith.constant 0 : i32
    return %arg0, %c0_i32, %c0_i32_0 : i32, i32, i32
  }
  func.func @transform_2(%arg0: i32) -> (i32, i32) {
    %c0_i32 = arith.constant 0 : i32
    %c0_i32_0 = arith.constant 0 : i32
    %c0_i32_1 = arith.constant 0 : i32
    return %c0_i32, %c0_i32_0 : i32, i32
  }
  func.func @transform_3(%arg0: i32) -> (i32, i32) {
    %c0_i32 = arith.constant 0 : i32
    %c0_i32_0 = arith.constant 0 : i32
    %c0_i32_1 = arith.constant 0 : i32
    return %c0_i32, %c0_i32_0 : i32, i32
  }
  func.func @transform_4(%arg0: i32) -> (i32, i32) {
    %c0_i32 = arith.constant 0 : i32
    %c0_i32_0 = arith.constant 0 : i32
    %c0_i32_1 = arith.constant 0 : i32
    return %c0_i32, %c0_i32_0 : i32, i32
  }
  func.func @transform_5(%arg0: i32) -> (i32, i32) {
    %c0_i32 = arith.constant 0 : i32
    %c0_i32_0 = arith.constant 0 : i32
    %c0_i32_1 = arith.constant 0 : i32
    return %c0_i32, %c0_i32_0 : i32, i32
  }
  func.func @transform_6(%arg0: i32) -> (i32, i32) {
    %c0_i32 = arith.constant 0 : i32
    %c0_i32_0 = arith.constant 0 : i32
    %c0_i32_1 = arith.constant 0 : i32
    return %c0_i32, %c0_i32_0 : i32, i32
  }
  func.func @transform_7(%arg0: i32) -> (i32, i32) {
    %c0_i32 = arith.constant 0 : i32
    %c0_i32_0 = arith.constant 0 : i32
    %c0_i32_1 = arith.constant 0 : i32
    return %c0_i32, %c0_i32_0 : i32, i32
  }
  func.func @transform_8(%arg0: i32) -> (i32, i32) {
    %c0_i32 = arith.constant 0 : i32
    %c0_i32_0 = arith.constant 0 : i32
    %c0_i32_1 = arith.constant 0 : i32
    return %c0_i32, %c0_i32_0 : i32, i32
  }
  func.func @transform_9(%arg0: i32) -> (i32, i32) {
    %c0_i32 = arith.constant 0 : i32
    %c0_i32_0 = arith.constant 0 : i32
    %c0_i32_1 = arith.constant 0 : i32
    return %c0_i32, %c0_i32_0 : i32, i32
  }
  func.func @transform_10(%arg0: i32) -> (i32, i32) {
    %c0_i32 = arith.constant 0 : i32
    %c0_i32_0 = arith.constant 0 : i32
    %c0_i32_1 = arith.constant 0 : i32
    return %c0_i32, %c0_i32_0 : i32, i32
  }
  func.func @transform_11(%arg0: i32) -> (i32, i32) {
    %c0_i32 = arith.constant 0 : i32
    %c0_i32_0 = arith.constant 0 : i32
    %c0_i32_1 = arith.constant 0 : i32
    return %c0_i32, %c0_i32_0 : i32, i32
  }
  func.func @transform_12(%arg0: i32) -> (i32, i32) {
    %c0_i32 = arith.constant 0 : i32
    %c0_i32_0 = arith.constant 0 : i32
    %c0_i32_1 = arith.constant 0 : i32
    return %c0_i32, %c0_i32_0 : i32, i32
  }
  func.func @transform_13(%arg0: i32) -> (i32, i32) {
    %c0_i32 = arith.constant 0 : i32
    %c0_i32_0 = arith.constant 0 : i32
    %c0_i32_1 = arith.constant 0 : i32
    return %c0_i32, %c0_i32_0 : i32, i32
  }
  func.func @transform_14(%arg0: i32) -> (i32, i32) {
    %c0_i32 = arith.constant 0 : i32
    %c0_i32_0 = arith.constant 0 : i32
    %c0_i32_1 = arith.constant 0 : i32
    return %c0_i32, %c0_i32_0 : i32, i32
  }
  func.func @transform_15(%arg0: i32) -> (i32, i32) {
    %c0_i32 = arith.constant 0 : i32
    %c0_i32_0 = arith.constant 0 : i32
    %c0_i32_1 = arith.constant 0 : i32
    return %c0_i32, %c0_i32_0 : i32, i32
  }
  func.func @transform_16(%arg0: i32) -> (i32, i32) {
    %c0_i32 = arith.constant 0 : i32
    %c0_i32_0 = arith.constant 0 : i32
    %c0_i32_1 = arith.constant 0 : i32
    return %c0_i32, %c0_i32_0 : i32, i32
  }
  func.func @transform_17(%arg0: i32) -> (i32, i32) {
    %c0_i32 = arith.constant 0 : i32
    %c0_i32_0 = arith.constant 0 : i32
    %c0_i32_1 = arith.constant 0 : i32
    return %c0_i32, %c0_i32_0 : i32, i32
  }
  func.func @transform_18(%arg0: i32) -> (i32, i32, i32) {
    %c0_i32 = arith.constant 0 : i32
    %c0_i32_0 = arith.constant 0 : i32
    %c0_i32_1 = arith.constant 0 : i32
    return %arg0, %c0_i32, %c0_i32_0 : i32, i32, i32
  }
}

</mosaic_0001>

<bundles_post_ra>
// kernel: tpu_custom_call.1
= control target key start
LH: loop header
LB: loop body
LE: loop exit
PB: predicated region body
PF: predicated region fallthrough
CT: control target
= control target key end

     0   :  { %s3033_s0 = inlined_call_operand.hbm [shape: f32[2,8,32], index: 0, kind: input, shape index: {}]   ;;  %s3034_s1 = inlined_call_operand.vmem [shape: f32[2,1,8], index: 1, kind: input, shape index: {}]   ;;  %s3035_s2 = inlined_call_operand.vmem [shape: f32[32,32], index: 2, kind: input, shape index: {}]   ;;  %s3036_s3 = inlined_call_operand.vmem [shape: f32[32,32], index: 3, kind: input, shape index: {}]   ;;  %s3037_s4 = inlined_call_operand.vmem [shape: f32[32,32], index: 4, kind: input, shape index: {}]   ;;  %s3038_s5 = inlined_call_operand.vmem [shape: f32[1,32], index: 5, kind: input, shape index: {}]   ;;  %s3039_s6 = inlined_call_operand.vmem [shape: f32[1,32], index: 6, kind: input, shape index: {}]   ;;  %s3040_s7 = inlined_call_operand.vmem [shape: f32[1,32], index: 7, kind: input, shape index: {}]   ;;  %s3041_s8 = inlined_call_operand.hbm [shape: f32[32,32], index: 8, kind: input, shape index: {}]   ;;  %s3042_s9 = inlined_call_operand.vmem [shape: f32[1,32], index: 9, kind: input, shape index: {}]   ;;  %s3043_s10 = inlined_call_operand.vmem [shape: f32[1,32], index: 10, kind: input, shape index: {}]   ;;  %s3044_s11 = inlined_call_operand.vmem [shape: f32[1,32], index: 11, kind: input, shape index: {}]   ;;  %s3045_s12 = inlined_call_operand.hbm [shape: f32[32,64], index: 12, kind: input, shape index: {}]   ;;  %s3046_s13 = inlined_call_operand.vmem [shape: f32[1,64], index: 13, kind: input, shape index: {}]   ;;  %s3047_s14 = inlined_call_operand.vmem [shape: f32[64,32], index: 14, kind: input, shape index: {}]   ;;  %s3048_s15 = inlined_call_operand.vmem [shape: f32[1,32], index: 15, kind: input, shape index: {}]   ;;  %s3049_s16 = inlined_call_operand.vmem [shape: f32[1,32], index: 16, kind: input, shape index: {}]   ;;  %s3050_s17 = inlined_call_operand.vmem [shape: f32[1,32], index: 17, kind: input, shape index: {}]   ;;  %s3051_s18 = inlined_call_operand.hbm [shape: f32[2,8,32], index: 18, kind: output, shape index: {}]  }
   0x1   :  { %3061 = sst [smem:[#allocation14_spill]] %s3033_s0 }
   0x2   :  { %3062 = sst [smem:[#allocation15_spill]] %s3034_s1 }
   0x3   :  { %3063 = sst [smem:[#allocation16_spill]] %s3035_s2 }
   0x4   :  { %3064 = sst [smem:[#allocation17_spill]] %s3036_s3 }
   0x5   :  { %3065 = sst [smem:[#allocation18_spill]] %s3037_s4 }
   0x6   :  { %3066 = sst [smem:[#allocation19_spill]] %s3041_s8 }
   0x7   :  { %3067 = sst [smem:[#allocation20_spill]] %s3046_s13 }
   0x8   :  { %3068 = sst [smem:[#allocation21_spill]] %s3048_s15 }
   0x9   :  { %3069 = sst [smem:[#allocation22_spill]] %s3049_s16 }
   0xa   :  { %3070 = sst [smem:[#allocation23_spill]] %s3050_s17 }
   0xb   :  { %3071 = sst [smem:[#allocation24_spill]] %s3051_s18 }
   0xc   :  { %23 = vsyncpa [#allocation3], 0 }
   0xd   :  { %25 = vsyncpa [#allocation3 + $0x1], 0 }
   0xe   :  { %26 = vsyncpa [#allocation6], 0 }
   0xf   :  { %27 = vsyncpa [#allocation4], 0 }
  0x10   :  { %29 = vsyncpa [#allocation4 + $0x1], 0  ;;  %s2612_s27 = smov 0   ;;  %s2614_s28 = smov 0  }
  0x11   :  { %s2616_s29 = smov 0   ;;  %s2618_s30 = smov 0  }
  0x12 LB: > { %3072 = sst [smem:[#allocation12_spill]] %s2488_s27  ;;  %s2633_s0 = sadd.s32 4294967295, %s2500_s30   ;;  %s2500_s30 = sphi %s2618_s30, %s3103_s30   ;;  %s2496_s29 = sphi %s2616_s29, %s3102_s29   ;;  %s2492_s28 = sphi %s2614_s28, %s3101_s28   ;;  %s2488_s27 = sphi %s2612_s27, %s3100_s27  }
  0x13   : > { %s1995_s19 = sadd.s32 4294967294, %s2500_s30   ;;  %p55_p0 = scmp.ne.s32.totalorder %s2492_s28, %s2488_s27 }
  0x14   : > { %p3057_p1 = scmp.eq.s32.totalorder %s2633_s0, 0  ;;  %p447_p3 = scmp.eq.s32.totalorder %s1995_s19, 1 }
  0x15   : > { %p1996_p5 = scmp.ge.s32.totalorder %s2500_s30, 1  ;;  %p454_p7 = scmp.lt.s32.totalorder %s2500_s30, 3 }
  0x16   : > { %p2642_p4 = por %p3057_p1, %p55_p0  ;;  %p2647_p6 = por %p447_p3, %p55_p0 }
  0x17   : > { %p2652_p8 = pnand %p1996_p5, %p454_p7  ;;  %s2502_s22 = smov [#allocation5]  }
  0x18   : > { %s3073_s1 = scalar_select %p2642_p4, 1, 0 }
  0x19   : > { %s3074_s20 = scalar_select %p2647_p6, 1, 0 }
  0x1a   : > { %s484_s2 = sshll.u32 %s2502_s22, 4  ;;  %p2258_p9 = pneg %p2652_p8  ;;  %s2656_s2 = int_to_ptr.vmem [resolvable:$true] %s484_s2 }
  0x1b   : > { %3075 = sst [smem:[#allocation13_spill]] %s3074_s20  ;;  %s2503_s24 = smov [#allocation7]  }
  0x1c   : > { %p2663_p11 = pnand %p2258_p9, %p3057_p1  ;;  %s506_s25 = sshll.u32 %s2503_s24, 4  ;;  %s2667_s25 = int_to_ptr.vmem [resolvable:$true] %s506_s25 }
  0x1d   : > { %s3078_s8 = sld [smem:[#allocation19_spill]] }
  0x1e   : > { %p2346_p13 = pneg %p2663_p11 }
  0x23   : > { %s2344_s22 = scalar_lea.hbm %s3078_s8, 512 }
  0x24   : > { %p2345_p12 = scmp.ne.s32.totalorder %s3078_s8, %s2344_s22  ;;  %p2351_p5 = scmp.lt.u32.totalorder %s2344_s22, %s3078_s8 }
  0x26   : > { %p2347_p0 = pnand %p2346_p13, %p2345_p12 }
  0x28   : > { %p2348_p3 = pneg %p2347_p0 }
  0x2a   : > { %p2353_p7 = pnand %p2351_p5, %p2348_p3 }
  0x2c   : > { %2356 = shalt.err (!%p2353_p7)
}
  0x2d   : > { %s2357_s24 = scalar_lea.vmem %s2656_s2, 512  ;;  %p2365_p2 = scmp.lt.s32.totalorder %s2656_s2, %s2656_s2 }
  0x2e   : > { %p2358_p9 = scmp.ne.s32.totalorder %s2656_s2, %s2357_s24  ;;  %p2366_p12 = scmp.lt.s32.totalorder %s2357_s24, %s2357_s24 }
  0x30   : > { %p2360_p10 = pnand %p2358_p9, %p2346_p13  ;;  %p2367_p0 = por %p2366_p12, %p2365_p2 }
  0x32   : > { %p2361_p1 = pneg %p2360_p10 }
  0x34   : > { %p2368_p6 = pnand %p2367_p0, %p2361_p1 }
  0x36   : > { %2371 = shalt.err (!%p2368_p6)
}
  0x37   : > { %s2504_s17 = smov 128   ;;  %s2505_s18 = smov 8  }
  0x38   : > { %2261 = dma.hbm_to_vmem [thread:$0]  (!%p2663_p11), %s3078_s8, 512, %s2656_s2, [#allocation6], %s2504_s17, %s2504_s17, %s2505_s18  }
  0x39   : > { %s2372_s22 = scalar_lea.hbm %s3045_s12, 512 }
  0x3a   : > { %p2373_p2 = scmp.ne.s32.totalorder %s3045_s12, %s2372_s22  ;;  %p2379_p10 = scmp.lt.u32.totalorder %s2372_s22, %s3045_s12 }
  0x3c   : > { %p2375_p1 = pnand %p2373_p2, %p2346_p13 }
  0x3e   : > { %p2376_p6 = pneg %p2375_p1 }
  0x40   : > { %p2381_p3 = pnand %p2379_p10, %p2376_p6 }
  0x42   : > { %2384 = shalt.err (!%p2381_p3)
}
  0x43   : > { %s2385_s2 = scalar_lea.vmem %s2667_s25, 512  ;;  %p2393_p12 = scmp.lt.s32.totalorder %s2667_s25, %s2667_s25 }
  0x44   : > { %p2386_p5 = scmp.ne.s32.totalorder %s2667_s25, %s2385_s2  ;;  %p2394_p0 = scmp.lt.s32.totalorder %s2385_s2, %s2385_s2 }
  0x46   : > { %p2388_p7 = pnand %p2386_p5, %p2346_p13  ;;  %p2395_p2 = por %p2394_p0, %p2393_p12 }
  0x48   : > { %p2389_p9 = pneg %p2388_p7 }
  0x4a   : > { %p2396_p1 = pnand %p2395_p2, %p2389_p9 }
  0x4c   : > { %2399 = shalt.err (!%p2396_p1)
}
  0x4d   : > { %2264 = dma.hbm_to_vmem [thread:$0]  (!%p2663_p11), %s3045_s12, 512, %s2667_s25, [#allocation6], %s2504_s17, %s2504_s17, %s2505_s18  }
  0x4e   : > { %s2722_s16 = sadd.s32 1, %s2500_s30   ;;  %s42_s23 = sadd.s32 1, %s2496_s29 }
  0x4f   : > { %s39_s27 = ssub.s32 %s2500_s30, %s2722_s16  ;;  %p49_p13 = scmp.ne.s32.totalorder %s2496_s29, %s2492_s28 }
  0x50   : > { %p40_p6 = scmp.eq.s32.totalorder %s39_s27, 0  ;;  %p50_p10 = scmp.eq.s32.totalorder %s2500_s30, 0 }
  0x51   : > { %p3079_p3 = scmp.eq.s32.totalorder %s2633_s0, 1  ;;  %p2275_p7 = scmp.lt.s32.totalorder %s2500_s30, 2 }
  0x52   : > { %s2738_s26 = scalar_select %p40_p6, %s2496_s29, %s42_s23  }
  0x53   : > { %p2732_p5 = por %p3079_p3, %p49_p13  ;;  %p51_p9 = por %p50_p10, %p49_p13 }
  0x54   : > { %s535_s19 = sand.u32 1, %s2496_s29   ;;  %s2001_s25 = sshll.u32 %s2500_s30, 7 }
  0x55   : > { %s3080_s20 = scalar_select %p2732_p5, 1, 0 }
  0x56   : > { %s2000_s22 = sshll.u32 %s535_s19, 3  ;;  %s3081_s24 = sld [smem:[#allocation14_spill]] }
  0x57   : > { %s539_s13 = scalar_lea.vmem [#allocation2], %s2000_s22  ;;  %p2749_p11 = pnand %p2275_p7, %p51_p9 }
  0x58   : > { %s546_s15 = sshll.u32 %s539_s13, 4  ;;  %s536_s27 = scalar_lea.sflag [#allocation3], %s535_s19  ;;  %s2747_s15 = int_to_ptr.vmem [resolvable:$true] %s546_s15 }
  0x59   : > { %p2402_p0 = pneg %p2749_p11 }
  0x5c   : > { %s2745_s2 = scalar_lea.hbm %s3081_s24, %s2001_s25  ;;  %s2405_s17 = scalar_lea.hbm %s3081_s24, 256 }
  0x5d   : > { %s2400_s8 = scalar_lea.hbm %s2745_s2, 128  ;;  %p2406_p13 = scmp.lt.u32.totalorder %s2745_s2, %s3081_s24 }
  0x5e   : > { %p2401_p12 = scmp.ne.s32.totalorder %s2745_s2, %s2400_s8  ;;  %p2407_p6 = scmp.lt.u32.totalorder %s2405_s17, %s2400_s8 }
  0x5f   : > { %p2409_p3 = scmp.lt.u32.totalorder %s2400_s8, %s2745_s2 }
  0x60   : > { %p2403_p2 = pnand %p2402_p0, %p2401_p12  ;;  %p2408_p10 = por %p2407_p6, %p2406_p13 }
  0x62   : > { %p2404_p1 = pneg %p2403_p2  ;;  %p2410_p7 = por %p2409_p3, %p2408_p10 }
  0x64   : > { %p2411_p9 = pnand %p2410_p7, %p2404_p1 }
  0x66   : > { %2414 = shalt.err (!%p2411_p9)
}
  0x67   : > { %s2415_s19 = scalar_lea.vmem %s2747_s15, 128  ;;  %s2506_s25 = smov [#allocation2]  }
  0x68   : > { %p2416_p12 = scmp.ne.s32.totalorder %s2747_s15, %s2415_s19  ;;  %s2420_s22 = sshll.u32 %s2506_s25, 4  ;;  %s2421_s22 = int_to_ptr.vmem [resolvable:$false] %s2420_s22 }
  0x69   : > { %s2422_s18 = scalar_lea.vmem %s2421_s22, 256  ;;  %p2423_p4 = scmp.lt.s32.totalorder %s2747_s15, %s2421_s22 }
  0x6a   : > { %p2418_p2 = pnand %p2416_p12, %p2402_p0  ;;  %p2424_p13 = scmp.lt.s32.totalorder %s2422_s18, %s2415_s19 }
  0x6c   : > { %p2419_p5 = pneg %p2418_p2  ;;  %p2425_p6 = por %p2424_p13, %p2423_p4 }
  0x6e   : > { %p2426_p10 = pnand %p2425_p6, %p2419_p5 }
  0x70   : > { %2429 = shalt.err (!%p2426_p10)
}
  0x71   : > { %2268 = dma.hbm_to_vmem [thread:$0]  (!%p2749_p11), %s2745_s2, 128, %s2747_s15, %s536_s27  }
  0x72   : > { %561 = sbr.rel (%p2652_p8) target bundleno = 2481 (0x9b1), region = 92  ;;  %s2781_s8 = sand.u32 (!%p2652_p8), 1, %s2492_s28  }
  0x73   : > { %s2003_s17 = sshll.u32 (!%p2652_p8), %s2781_s8, 3  ;;  %s564_s13 = scalar_lea.sflag (!%p2652_p8), [#allocation3], %s2781_s8 }
  0x74   : > { %s567_s19 = scalar_lea.vmem (!%p2652_p8), [#allocation2], %s2003_s17  ;;  %p3083_p4 = scmp.ne.s32.totalorder (!%p2652_p8), %s3073_s1, 0 }
  0x79   : > { %2475 = dma.done.wait (%p3083_p4), %s564_s13, 128  }
  0x7a   : > { %2477 = vsyncadd (%p3083_p4), %s564_s13, 4294967168  ;;  %p3084_p5 = scmp.eq.s32.totalorder %s2633_s0, 0 }
  0x7c   : > { %2479 = dma.done.wait (%p3084_p5), [#allocation6], 1024   ;;  %p3085_p8 = pmov %p3084_p5 }
  0x7d   : > { %v2507_v0 = vmov 0.0|0.0   ;;  %vm2508_vm0 = vmmov 0   ;;  %v2509_v1 = vmov 0.0   ;;  %s3086_s2 = sld [smem:[#allocation16_spill]]  ;;  %s3087_s3 = sld [smem:[#allocation17_spill]]  ;;  %v2820_v10 = vld [vmem:[%s567_s19] sm:$0xff] }
  0x7e   : > { %2481 = vsyncadd (%p3085_p8), [#allocation6], 4294966272  ;;  %2204 = vmatprep.subr.bf16.mxu1 %v2507_v0  ;;  %2098 = vmatprep.mubr.msk.f32.mxu1 %vm2508_vm0, %v2509_v1  ;;  %vm647_vm1 = vcmask 261120   ;;  %s3088_s4 = sld [smem:[#allocation18_spill]]  ;;  %v2009_v23 = vld [vmem:[%s3039_s6] ss:$0 sm:$0xff] }
  0x7f   : > { %2216 = vmatprep.subr.bf16.mxu0 %v2507_v0  ;;  %2120 = vmatprep.mubr.msk.f32.mxu0 %vm2508_vm0, %v2509_v1  ;;  %vm889_vm2 = vcmask 64512   ;;  %v2007_v27 = vld [vmem:[%s3038_s5] ss:$0 sm:$0xff]  ;;  %s2510_s13 = smov 112   ;;  %s2511_s1 = smov 120   ;;  %vm1559_vm3 = vcmask 130048  }
  0x80   : > { %s2512_s21 = smov 104   ;;  %v2011_v29 = vld [vmem:[%s3040_s7] ss:$0 sm:$0xff]  ;;  %p631_p11 = scmp.lt.s32.totalorder %s2633_s0, 1  ;;  %vm1561_vm4 = vcmask 195584   ;;  %vm1778_vm5 = vcmask 523264  }
  0x81   : > { %s3089_s19 = sld [smem:[#allocation15_spill]]  ;;  %s3090_s22 = sld [smem:[#allocation20_spill]] }
  0x82   : > { %s632_s27 = scalar_select %p631_p11, %s2633_s0, 1 }
  0x83   : > { %v636_v2 = vld [vmem:[%s3086_s2] sm:$0xff]  ;;  %v637_v3 = vld [vmem:[%s3086_s2 + $0x8] sm:$0xff]  ;;  %v638_v4 = vld [vmem:[%s3086_s2 + $0x10] sm:$0xff]  ;;  %s3092_s15 = sld [smem:[#allocation22_spill]]  ;;  %s3093_s25 = sld [smem:[#allocation23_spill]] }
  0x84   : > { %v2205_v5 = vpack.c.bf16 %v637_v3, %v636_v2  ;;  %v639_v6 = vld [vmem:[%s3086_s2 + $0x18] sm:$0xff]  ;;  %v721_v8 = vld [vmem:[%s3087_s3] sm:$0xff]  ;;  %v722_v9 = vld [vmem:[%s3087_s3 + $0x8] sm:$0xff]  ;;  %p3095_p1 = scmp.ne.s32.totalorder %s3080_s20, 0 }
  0x85   : > { %v2208_v7 = vpack.c.bf16 %v639_v6, %v638_v4  ;;  %v2211_v11 = vpack.c.bf16 %v722_v9, %v721_v8  ;;  %v723_v12 = vld [vmem:[%s3087_s3 + $0x10] sm:$0xff]  ;;  %v724_v13 = vld [vmem:[%s3087_s3 + $0x18] sm:$0xff]  ;;  %v802_v15 = vld [vmem:[%s3088_s4] sm:$0xff]  ;;  %s3094_s3 = sld [smem:[#allocation24_spill]] }
  0x86   : > { %2206 = vmatpush3.bf16.msra.mxu1 %v2205_v5  ;;  %v2214_v14 = vpack.c.bf16 %v724_v13, %v723_v12  ;;  %v803_v16 = vld [vmem:[%s3088_s4 + $0x8] sm:$0xff]  ;;  %v804_v17 = vld [vmem:[%s3088_s4 + $0x10] sm:$0xff]  ;;  %v805_v19 = vld [vmem:[%s3088_s4 + $0x18] sm:$0xff] }
  0x87   : > { %2207 = vmatprep.subr.bf16.mxu1 %v2507_v0  ;;  %v2217_v18 = vpack.c.bf16 %v803_v16, %v802_v15  ;;  %v2220_v20 = vpack.c.bf16 %v805_v19, %v804_v17  ;;  %s633_s18 = scalar_lea.vmem %s3089_s19, %s632_s27  ;;  %s630_s19 = scalar_lea.vmem [#allocation8], %s2003_s17 }
  0x88   : > { %v2013_v39 = vld [vmem:[%s633_s18] ss:$0 sm:$0xff]  ;;  %s1897_s18 = sshll.u32 %s630_s19, 4  ;;  %s2990_s18 = int_to_ptr.vmem [resolvable:$true] %s1897_s18 }
  0x89   : > { %2218 = vmatpush3.bf16.msra.mxu0 %v2217_v18 }
  0x8a   : > { %2209 = vmatpush3.bf16.msra.mxu1 %v2208_v7  ;;  %2219 = vmatprep.subr.bf16.mxu0 %v2507_v0 }
  0x8b   : > { %2210 = vmatprep.subr.bf16.mxu1 %v2507_v0 }
  0x8d   : > { %2099 = vmatmul.mubr.msk.f32.vlgmr.msra.gmra.mrb[0].mxu1 %vm647_vm1, %v2820_v10  ;;  %2221 = vmatpush3.bf16.msra.mxu0 %v2220_v20 }
  0x8e   : > { %2212 = vmatpush3.bf16.msra.mxu1 %v2211_v11  ;;  %2109 = vmatprep.mubr.msk.f32.mxu1 %vm2508_vm0, %v2509_v1 }
  0x8f   : > { %2213 = vmatprep.subr.bf16.mxu1 %v2507_v0  ;;  %2133 = vmatprep.subr.mxu0 %v2509_v1 }
  0x90   : > { %2121 = vmatmul.mubr.msk.f32.vlgmr.msra.gmra.mrb[0].mxu0 %vm647_vm1, %v2820_v10 }
  0x91   : > { %2135 = vmatprep.mubr.msk.f32.mxu0 %vm2508_vm0, %v2509_v1 }
  0x92   : > { %2215 = vmatpush3.bf16.msra.mxu1 %v2214_v14 }
  0x93   : > { %2123 = vmatprep.subr.mxu1 %v2509_v1 }
  0x95   : > { %2110 = vmatmul.mubr.msk.f32.vlgmr.msra.gmra.mrb[2].mxu1 %vm647_vm1, %v2820_v10 }
  0x96   : > { %2125 = vmatprep.mubr.msk.f32.mxu1 %vm2508_vm0, %v2509_v1 }
 0x160   : > { %v717_v21 = vpop.f32.mrb[0].mxu1 }
 0x161   : > { %v2100_v22 = vpop.f32.mrb[1].mxu1  ;;  %v718_v28 = vadd.f32 %v2007_v27, %v717_v21 }
 0x162   : > { %v1563_v22 = vld [vmem:[#allocation5] sm:$0xff] }
 0x163   : > { %v879_v30 = vpop.f32.mrb[0].mxu0 }
 0x164   : > { %v880_v31 = vadd.f32 %v2011_v29, %v879_v30  ;;  %v2122_v32 = vpop.f32.mrb[1].mxu0 }
 0x168   : > { %v798_v24 = vpop.f32.mrb[2].mxu1 }
 0x169   : > { %v799_v25 = vadd.f32 %v2009_v23, %v798_v24  ;;  %v2111_v26 = vpop.f32.mrb[3].mxu1  ;;  %v1564_v23 = vld [vmem:[#allocation5 + $0x8] sm:$0xff] }
 0x16a   : > { %v2223_v24 = vpack.c.bf16 %v1564_v23, %v1563_v22  ;;  %v1566_v26 = vld [vmem:[#allocation5 + $0x18] sm:$0xff]  ;;  %v1770_v22 = vld [vmem:[%s3047_s14 + $0x38] sm:$0xff] }
 0x16b   : > { %1218 = vrot.lane.b32.xlu1 %v799_v25, %s2510_s13  ;;  %1052 = vrot.lane.b32.xlu0 %v799_v25, %s2511_s1 }
 0x16c   : > { %2124 = vmatpush3.xpose.msk.msra.mxu1 %vm889_vm2, %v799_v25 }
 0x16d   : > { %2128 = vmatprep.subr.mxu1 %v2509_v1 }
 0x16f   : > { %2126 = vmatmul.mubr.msk.f32.vlgmr.msra.gmra.mrb[4].mxu1 %vm889_vm2, %v718_v28  ;;  %1216 = vrot.lane.b32.xlu1 %v718_v28, %s2510_s13 }
 0x170   : > { %1050 = vrot.lane.b32.xlu0 %v718_v28, %s2511_s1  ;;  %2130 = vmatprep.mubr.msk.f32.mxu1 %vm2508_vm0, %v2509_v1 }
 0x171   : > { %2129 = vmatpush3.msra.mxu1 %v880_v31 }
 0x172   : > { %2138 = vmatprep.subr.mxu1 %v2509_v1 }
 0x173   : > { %1381 = vrot.lane.b32.xlu1 %v718_v28, %s2512_s21 }
 0x174   : > { %1383 = vrot.lane.b32.xlu0 %v799_v25, %s2512_s21  ;;  %v1565_v25 = vld [vmem:[#allocation5 + $0x10] sm:$0xff] }
 0x175   : > { %v2226_v28 = vpack.c.bf16 %v1566_v26, %v1565_v25 }
 0x177   : > { %1138 = vrot.lane.b32.xlu1 %v880_v31, %s2511_s1  ;;  %s2514_s1 = smov 16  }
 0x1dd   : > { %v1053_v33 = vpop.permute.xlu0 %1052  ;;  %v1219_v34 = vpop.permute.xlu1 %1218 }
 0x1de   : > { %2134 = vmatpush3.xpose.msk.msra.mxu0 %vm889_vm2, %v1053_v33 }
 0x1df   : > { %2143 = vmatprep.subr.mxu0 %v2509_v1 }
 0x1e1   : > { %v1217_v36 = vpop.permute.xlu1 %1216 }
 0x1e2   : > { %v1051_v35 = vpop.permute.xlu0 %1050 }
 0x1e3   : > { %2136 = vmatmul.mubr.msk.f32.vlgmr.msra.gmra.mrb[2].mxu0 %vm889_vm2, %v1051_v35 }
 0x1e4   : > { %2144 = vmatpush3.xpose.msk.msra.mxu0 %vm889_vm2, %v1219_v34  ;;  %2145 = vmatprep.mubr.msk.f32.mxu0 %vm2508_vm0, %v2509_v1 }
 0x1e5   : > { %2153 = vmatprep.subr.mxu0 %v2509_v1  ;;  %v1382_v38 = vpop.permute.xlu1 %1381 }
 0x1e6   : > { %v1384_v37 = vpop.permute.xlu0 %1383 }
 0x1e7   : > { %2146 = vmatmul.mubr.msk.f32.vlgmr.msra.gmra.mrb[4].mxu0 %vm889_vm2, %v1217_v36 }
 0x1e8   : > { %2154 = vmatpush3.xpose.msk.msra.mxu0 %vm889_vm2, %v1384_v37  ;;  %2155 = vmatprep.mubr.msk.f32.mxu0 %vm2508_vm0, %v2509_v1 }
 0x1e9   : > { %2222 = vmatprep.subr.bf16.mxu0 %v2507_v0  ;;  %v1139_v59 = vpop.permute.xlu1 %1138 }
 0x1eb   : > { %2156 = vmatmul.mubr.msk.f32.vlgmr.msra.gmra.mrb[6].mxu0 %vm889_vm2, %v1382_v38 }
 0x1ec   : > { %2171 = vmatprep.mubr.msk.f32.mxu0 %vm2508_vm0, %v2509_v1  ;;  %2224 = vmatpush3.bf16.msra.mxu0 %v2223_v24  ;;  %v2030_v24 = vld [vmem:[%s3090_s22] ss:$0 sm:$0xff]  ;;  %s2037_s22 = sshll.u32 %s2633_s0, 7  ;;  %s2516_s0 = smov [#allocation8]  }
 0x1ed   : > { %2225 = vmatprep.subr.bf16.mxu0 %v2507_v0  ;;  %s2988_s4 = scalar_lea.hbm %s3094_s3, %s2037_s22  ;;  %s2434_s17 = sshll.u32 %s2516_s0, 4  ;;  %s2435_s17 = int_to_ptr.vmem [resolvable:$false] %s2434_s17 }
 0x1ee   : > { %p2437_p9 = scmp.lt.s32.totalorder %s2990_s18, %s2435_s17 }
 0x1f0   : > { %2227 = vmatpush3.bf16.msra.mxu0 %v2226_v28 }
 0x1f1   : > { %2234 = vmatprep.subr.bf16.mxu0 %v2507_v0 }
 0x242   : > { %v962_v40 = vpop.f32.mrb[4].mxu1 }
 0x243   : > { %v963_v41 = vadd.f32 %v2013_v39, %v962_v40  ;;  %v2127_v42 = vpop.f32.mrb[5].mxu1 }
 0x245   : > { %v966_v43 = vsel %vm889_vm2, %v963_v41, -inf }
 0x246   : > { %967 = vmax.xlane.f32.xlu0 %v966_v43 }
 0x2b6   : > { %v1124_v44 = vpop.f32.mrb[2].mxu0 }
 0x2b7   : > { %v1125_v45 = vadd.f32 %v2013_v39, %v1124_v44  ;;  %v2137_v46 = vpop.f32.mrb[3].mxu0 }
 0x2b9   : > { %v1128_v47 = vsel %vm889_vm2, %v1125_v45, -inf }
 0x2ba   : > { %1129 = vmax.xlane.f32.xlu1 %v1128_v47  ;;  %v1290_v48 = vpop.f32.mrb[4].mxu0 }
 0x2bb   : > { %v1291_v49 = vadd.f32 %v2013_v39, %v1290_v48  ;;  %v2147_v50 = vpop.f32.mrb[5].mxu0 }
 0x2bc   : > { %v2026_v50 = vld [vmem:[%s3042_s9] ss:$0 sm:$0xff] }
 0x2bd   : > { %v1294_v51 = vsel %vm889_vm2, %v1291_v49, -inf }
 0x2be   : > { %v1455_v52 = vpop.f32.mrb[6].mxu0  ;;  %1295 = vmax.xlane.f32.xlu0 %v1294_v51 }
 0x2bf   : > { %v1456_v53 = vadd.f32 %v2013_v39, %v1455_v52  ;;  %v2157_v54 = vpop.f32.mrb[7].mxu0 }
 0x2c1   : > { %v1459_v55 = vsel %vm889_vm2, %v1456_v53, -inf }
 0x2c2   : > { %1460 = vmax.xlane.f32.xlu0 %v1459_v55 }
 0x2cb   : > { %1468 = vrot.lane.b32.xlu1 %v880_v31, %s2512_s21  ;;  %s2515_s21 = smov 24  }
 0x2d3   : > { %v968_v56 = vpop.xlane.xlu0 %967 }
 0x2d4   : > { %v969_v57 = vsub.f32 %v963_v41, %v968_v56 }
 0x2d6   : > { %v970_v58 = vmul.f32 1.442695, %v969_v57 }
 0x2d8   : > { %2324 = vpow2.f32 %v970_v58  ;;  %1303 = vrot.lane.b32.xlu0 %v880_v31, %s2510_s13  ;;  %s2513_s13 = smov 8  }
 0x2e2   : > { %v2325_v60 = vpop.eup %2324 }
 0x2e3   : > { %2131 = vmatmul.mubr.msk.f32.vlgmr.msra.gmra.mrb[6].mxu1 %vm889_vm2, %v2325_v60  ;;  %v972_v14 = vsel %vm889_vm2, %v2325_v60, 0.0 }
 0x2e4   : > { %2139 = vmatpush3.msra.mxu1 %v1139_v59  ;;  %2140 = vmatprep.mubr.msk.f32.mxu1 %vm2508_vm0, %v2509_v1 }
 0x2e5   : > { %2148 = vmatprep.subr.mxu1 %v2509_v1 }
 0x347   : > { %v1130_v61 = vpop.xlane.xlu1 %1129 }
 0x348   : > { %v1131_v62 = vsub.f32 %v1125_v45, %v1130_v61  ;;  %v1679_v61 = vld [vmem:[#allocation7 + $0x8] sm:$0xff] }
 0x34a   : > { %v1132_v63 = vmul.f32 1.442695, %v1131_v62 }
 0x34b   : > { %v1296_v2 = vpop.xlane.xlu0 %1295  ;;  %v1469_v13 = vpop.permute.xlu1 %1468 }
 0x34c   : > { %2326 = vpow2.f32 %v1132_v63  ;;  %v1297_v3 = vsub.f32 %v1291_v49, %v1296_v2  ;;  %v1680_v63 = vld [vmem:[#allocation7 + $0x10] sm:$0xff]  ;;  %v1681_v2 = vld [vmem:[#allocation7 + $0x18] sm:$0xff] }
 0x34e   : > { %v1298_v4 = vmul.f32 1.442695, %v1297_v3  ;;  %v2232_v3 = vpack.c.bf16 %v1681_v2, %v1680_v63 }
 0x34f   : > { %v1461_v5 = vpop.xlane.xlu0 %1460 }
 0x350   : > { %2328 = vpow2.f32 %v1298_v4  ;;  %v1462_v6 = vsub.f32 %v1456_v53, %v1461_v5  ;;  %v1764_v4 = vld [vmem:[%s3047_s14 + $0x8] sm:$0xff]  ;;  %v1765_v5 = vld [vmem:[%s3047_s14 + $0x10] sm:$0xff] }
 0x352   : > { %v1463_v7 = vmul.f32 1.442695, %v1462_v6 }
 0x353   : > { %v1304_v9 = vpop.permute.xlu0 %1303 }
 0x354   : > { %2330 = vpow2.f32 %v1463_v7  ;;  %v1766_v7 = vld [vmem:[%s3047_s14 + $0x18] sm:$0xff] }
 0x356   : > { %v2327_v8 = vpop.eup %2326 }
 0x357   : > { %2141 = vmatmul.mubr.msk.f32.vlgmr.msra.gmra.mrb[8].mxu1 %vm889_vm2, %v2327_v8  ;;  %v1134_v11 = vsel %vm889_vm2, %v2327_v8, 0.0  ;;  %v2238_v8 = vpack.c.bf16 %v1766_v7, %v1765_v5 }
 0x358   : > { %2149 = vmatpush3.msra.mxu1 %v1304_v9  ;;  %1135 = vadd.xlane.f32.xlu1 %v1134_v11  ;;  %v1767_v9 = vld [vmem:[%s3047_s14 + $0x20] sm:$0xff]  ;;  %v1768_v11 = vld [vmem:[%s3047_s14 + $0x28] sm:$0xff] }
 0x359   : > { %2150 = vmatprep.mubr.msk.f32.mxu1 %vm2508_vm0, %v2509_v1  ;;  %2158 = vmatprep.subr.mxu1 %v2509_v1 }
 0x35a   : > { %v2329_v12 = vpop.eup %2328 }
 0x35b   : > { %2151 = vmatmul.mubr.msk.f32.vlgmr.msra.gmra.mrb[10].mxu1 %vm889_vm2, %v2329_v12  ;;  %v1300_v15 = vsel %vm889_vm2, %v2329_v12, 0.0  ;;  %v2241_v12 = vpack.c.bf16 %v1768_v11, %v1767_v9 }
 0x35c   : > { %2159 = vmatpush3.msra.mxu1 %v1469_v13  ;;  %973 = vadd.xlane.f32.xlu1 %v972_v14 }
 0x35d   : > { %1301 = vadd.xlane.f32.xlu0 %v1300_v15  ;;  %2160 = vmatprep.mubr.msk.f32.mxu1 %vm2508_vm0, %v2509_v1 }
 0x35e   : > { %v2331_v16 = vpop.eup %2330  ;;  %2228 = vmatprep.subr.bf16.mxu1 %v2507_v0 }
 0x35f   : > { %2161 = vmatmul.mubr.msk.f32.vlgmr.msra.gmra.mrb[12].mxu1 %vm889_vm2, %v2331_v16  ;;  %v1465_v17 = vsel %vm889_vm2, %v2331_v16, 0.0 }
 0x360   : > { %2182 = vmatprep.mubr.msk.f32.mxu1 %vm2508_vm0, %v2509_v1 }
 0x361   : > { %1466 = vadd.xlane.f32.xlu0 %v1465_v17  ;;  %v2028_v17 = vld [vmem:[%s3043_s10] ss:$0 sm:$0xff] }
 0x3b6   : > { %v1044_v18 = vpop.f32.mrb[6].mxu1 }
 0x3b7   : > { %v2132_v19 = vpop.f32.mrb[7].mxu1 }
 0x3b8   : > { %v2029_v19 = vld [vmem:[%s3044_s11] ss:$0 sm:$0xff] }
 0x3e5   : > { %v1136_v20 = vpop.xlane.xlu1 %1135 }
 0x3e6   : > { %2332 = vrcp.f32 %v1136_v20 }
 0x3e9   : > { %v974_v41 = vpop.xlane.xlu1 %973 }
 0x3ea   : > { %v1302_v21 = vpop.xlane.xlu0 %1301 }
 0x3eb   : > { %2334 = vrcp.f32 %v1302_v21 }
 0x3ee   : > { %v1467_v27 = vpop.xlane.xlu0 %1466 }
 0x3ef   : > { %2336 = vrcp.f32 %v1467_v27 }
 0x3f0   : > { %v2333_v29 = vpop.eup %2332  ;;  %2338 = vrcp.f32 %v974_v41 }
 0x3f5   : > { %v2335_v33 = vpop.eup %2334 }
 0x3f9   : > { %v2337_v37 = vpop.eup %2336 }
 0x3fa   : > { %v2339_v42 = vpop.eup %2338 }
 0x3fb   : > { %v1049_v45 = vmul.f32 %v2339_v42, %v1044_v18 }
 0x42a   : > { %v1210_v30 = vpop.f32.mrb[8].mxu1 }
 0x42b   : > { %v1215_v31 = vmul.f32 %v2333_v29, %v1210_v30  ;;  %v2142_v32 = vpop.f32.mrb[9].mxu1 }
 0x42d   : > { %1547 = vrot.lane.b32.xlu0 %v1215_v31, %s2513_s13  ;;  %s3091_s13 = sld [smem:[#allocation21_spill]] }
 0x42e   : > { %v1375_v34 = vpop.f32.mrb[10].mxu1 }
 0x42f   : > { %v1380_v35 = vmul.f32 %v2335_v33, %v1375_v34  ;;  %v2152_v36 = vpop.f32.mrb[11].mxu1 }
 0x431   : > { %1551 = vrot.lane.b32.xlu1 %v1380_v35, %s2514_s1  ;;  %s1884_s1 = scalar_lea.sflag [#allocation4], %s2781_s8 }
 0x432   : > { %v1540_v38 = vpop.f32.mrb[12].mxu1 }
 0x433   : > { %v1545_v39 = vmul.f32 %v2337_v37, %v1540_v38  ;;  %v2162_v40 = vpop.f32.mrb[13].mxu1  ;;  %v2032_v29 = vld [vmem:[%s3091_s13] ss:$0 sm:$0xff] }
 0x435   : > { %1555 = vrot.lane.b32.xlu1 %v1545_v39, %s2515_s21  ;;  %s2430_s21 = scalar_lea.vmem %s2990_s18, 128 }
 0x436   : > { %p2431_p0 = scmp.ne.s32.totalorder %s2990_s18, %s2430_s21 }
 0x438   : > { %p2432_p3 = pnand %p2431_p0, %p3095_p1 }
 0x43a   : > { %p2433_p7 = pneg %p2432_p3 }
 0x49f   : > { %v1548_v43 = vpop.permute.xlu0 %1547 }
 0x4a0   : > { %v1558_v46 = vsel %vm889_vm2, %v1049_v45, %v1548_v43 }
 0x4a3   : > { %v1552_v44 = vpop.permute.xlu1 %1551 }
 0x4a4   : > { %v1560_v47 = vsel %vm1559_vm3, %v1558_v46, %v1552_v44  ;;  %v2034_v44 = vld [vmem:[%s3092_s15] ss:$0 sm:$0xff]  ;;  %s2436_s15 = scalar_lea.vmem %s2435_s17, 256 }
 0x4a5   : > { %v2035_v46 = vld [vmem:[%s3093_s25] ss:$0 sm:$0xff]  ;;  %p2438_p12 = scmp.lt.s32.totalorder %s2436_s15, %s2430_s21 }
 0x4a7   : > { %v1556_v48 = vpop.permute.xlu1 %1555  ;;  %p2439_p2 = por %p2438_p12, %p2437_p9 }
 0x4a8   : > { %v1562_v49 = vsel %vm1561_vm4, %v1560_v47, %v1556_v48 }
 0x4a9   : > { %2172 = vmatmul.mubr.msk.f32.vlgmr.msra.gmra.mrb[8].mxu0 %vm647_vm1, %v1562_v49  ;;  %p2440_p13 = pnand %p2439_p2, %p2433_p7 }
 0x4aa   : > { %2201 = vmatprep.mubr.msk.f32.mxu0 %vm2508_vm0, %v2509_v1  ;;  %v1678_v1 = vld [vmem:[#allocation7] sm:$0xff] }
 0x4ab   : > { %v2229_v62 = vpack.c.bf16 %v1679_v61, %v1678_v1 }
 0x4ad   : > { %2230 = vmatpush3.bf16.msra.mxu1 %v2229_v62 }
 0x4ae   : > { %2231 = vmatprep.subr.bf16.mxu1 %v2507_v0 }
 0x4b1   : > { %2233 = vmatpush3.bf16.msra.mxu1 %v2232_v3 }
 0x57c   : > { %v1643_v51 = vpop.f32.mrb[8].mxu0 }
 0x57d   : > { %v1644_v52 = vadd.f32 %v2026_v50, %v1643_v51  ;;  %v2173_v53 = vpop.f32.mrb[9].mxu0 }
 0x57f   : > { %v1647_v54 = vadd.f32 %v1644_v52, %v2820_v10  ;;  %v1763_v10 = vld [vmem:[%s3047_s14] sm:$0xff] }
 0x580   : > { %v2235_v6 = vpack.c.bf16 %v1764_v4, %v1763_v10 }
 0x581   : > { %v1648_v55 = vsel %vm647_vm1, %v1647_v54, 0.0 }
 0x582   : > { %1649 = vadd.xlane.f32.xlu0 %v1648_v55  ;;  %2236 = vmatpush3.bf16.msra.mxu0 %v2235_v6 }
 0x583   : > { %2237 = vmatprep.subr.bf16.mxu0 %v2507_v0 }
 0x586   : > { %2239 = vmatpush3.bf16.msra.mxu0 %v2238_v8 }
 0x587   : > { %2240 = vmatprep.subr.bf16.mxu0 %v2507_v0 }
 0x58a   : > { %2242 = vmatpush3.bf16.msra.mxu0 %v2241_v12 }
 0x58b   : > { %2243 = vmatprep.subr.bf16.mxu0 %v2507_v0  ;;  %v1769_v0 = vld [vmem:[%s3047_s14 + $0x30] sm:$0xff] }
 0x58c   : > { %v2244_v23 = vpack.c.bf16 %v1770_v22, %v1769_v0 }
 0x58e   : > { %2245 = vmatpush3.bf16.msra.mxu0 %v2244_v23 }
 0x60f   : > { %v1650_v56 = vpop.xlane.xlu0 %1649 }
 0x610   : > { %v1652_v57 = vmul.f32 0.03125, %v1650_v56 }
 0x612   : > { %v1653_v58 = vsub.f32 %v1647_v54, %v1652_v57 }
 0x614   : > { %v1654_v59 = vmul.f32 %v1653_v58, %v1653_v58 }
 0x616   : > { %v1655_v60 = vsel %vm647_vm1, %v1654_v59, 0.0 }
 0x617   : > { %1656 = vadd.xlane.f32.xlu1 %v1655_v60 }
 0x6a4   : > { %v1657_v13 = vpop.xlane.xlu1 %1656 }
 0x6a5   : > { %v1658_v14 = vmul.f32 0.03125, %v1657_v13 }
 0x6a7   : > { %v1659_v15 = vadd.f32 1e-05, %v1658_v14 }
 0x6a9   : > { %2340 = vrsqrt.f32 %v1659_v15 }
 0x6b3   : > { %v2341_v16 = vpop.eup %2340 }
 0x6b4   : > { %v1661_v18 = vmul.f32 %v2341_v16, %v1653_v58 }
 0x6b6   : > { %v1669_v20 = vmul.f32 %v2028_v17, %v1661_v18 }
 0x6b8   : > { %v1677_v21 = vadd.f32 %v2029_v19, %v1669_v20 }
 0x6ba   : > { %2183 = vmatmul.mubr.msk.f32.vlgmr.msra.gmra.mrb[14].mxu1 %vm647_vm1, %v1677_v21 }
 0x78d   : > { %v1758_v25 = vpop.f32.mrb[14].mxu1 }
 0x78e   : > { %v1759_v26 = vadd.f32 %v2030_v24, %v1758_v25  ;;  %v2184_v27 = vpop.f32.mrb[15].mxu1 }
 0x790   : > { %v1762_v28 = vmax.f32 %v1759_v26, 0.0 }
 0x792   : > { %2202 = vmatmul.mubr.msk.f32.vlgmr.msra.gmra.mrb[10].mxu0 %vm1778_vm5, %v1762_v28 }
 0x865   : > { %v1848_v30 = vpop.f32.mrb[10].mxu0 }
 0x866   : > { %v1849_v31 = vadd.f32 %v2032_v29, %v1848_v30  ;;  %v2203_v32 = vpop.f32.mrb[11].mxu0 }
 0x868   : > { %v1852_v33 = vadd.f32 %v1849_v31, %v1677_v21 }
 0x86a   : > { %v1853_v34 = vsel %vm647_vm1, %v1852_v33, 0.0 }
 0x86b   : > { %1854 = vadd.xlane.f32.xlu0 %v1853_v34 }
 0x8f8   : > { %v1855_v35 = vpop.xlane.xlu0 %1854 }
 0x8f9   : > { %v1856_v36 = vmul.f32 0.03125, %v1855_v35 }
 0x8fb   : > { %v1857_v37 = vsub.f32 %v1852_v33, %v1856_v36 }
 0x8fd   : > { %v1858_v38 = vmul.f32 %v1857_v37, %v1857_v37 }
 0x8ff   : > { %v1859_v39 = vsel %vm647_vm1, %v1858_v38, 0.0 }
 0x900   : > { %1860 = vadd.xlane.f32.xlu0 %v1859_v39 }
 0x98d   : > { %v1861_v40 = vpop.xlane.xlu0 %1860 }
 0x98e   : > { %v1862_v41 = vmul.f32 0.03125, %v1861_v40 }
 0x990   : > { %v1863_v42 = vadd.f32 1e-05, %v1862_v41 }
 0x992   : > { %2342 = vrsqrt.f32 %v1863_v42 }
 0x99c   : > { %v2343_v43 = vpop.eup %2342 }
 0x99d   : > { %v1865_v45 = vmul.f32 %v2343_v43, %v1857_v37 }
 0x99f   : > { %v1873_v47 = vmul.f32 %v2034_v44, %v1865_v45 }
 0x9a1   : > { %v1881_v48 = vadd.f32 %v2035_v46, %v1873_v47 }
 0x9a3   : > { %1882 = vst.msk [vmem:[%s630_s19] sm:$0xff] %vm647_vm1, %v1881_v48 }
 0x9a4   : > { %2443 = shalt.err (!%p2440_p13)
}
 0x9a5   : > { %s2444_s8 = scalar_lea.hbm %s2988_s4, 128  ;;  %s2448_s27 = scalar_lea.hbm %s3094_s3, 256 }
 0x9a6   : > { %p2445_p6 = scmp.ne.s32.totalorder %s2988_s4, %s2444_s8  ;;  %p2449_p5 = scmp.lt.u32.totalorder %s2988_s4, %s3094_s3 }
 0x9a7   : > { %p2450_p8 = scmp.lt.u32.totalorder %s2448_s27, %s2444_s8  ;;  %p2452_p0 = scmp.lt.u32.totalorder %s2444_s8, %s2988_s4 }
 0x9a8   : > { %p2446_p10 = pnand %p2445_p6, %p3095_p1 }
 0x9a9   : > { %p2451_p11 = por %p2450_p8, %p2449_p5 }
 0x9aa   : > { %p2447_p4 = pneg %p2446_p10 }
 0x9ab   : > { %p2453_p3 = por %p2452_p0, %p2451_p11 }
 0x9ad   : > { %p2454_p7 = pnand %p2453_p3, %p2447_p4 }
 0x9af   : > { %2457 = shalt.err (!%p2454_p7)
}
 0x9b0   : > { %2256 = dma.vmem_to_hbm [thread:$0]  (%p3095_p1), %s2990_s18, 128, %s2988_s4, %s1884_s1  }
 0x9b1 PF: > { %s3096_s19 = sld [smem:[#allocation12_spill]]  ;;  %s3097_s13 = sld [smem:[#allocation13_spill]] }
 0x9b2   : > { %p3099_p12 = scmp.ge.s32.totalorder %s2500_s30, 2 }
 0x9b7   : > { %s1909_s21 = sand.u32 1, %s3096_s19   ;;  %p3098_p9 = scmp.ne.s32.totalorder %s3097_s13, 0 }
 0x9b8   : > { %s1910_s0 = scalar_lea.sflag [#allocation4], %s1909_s21 }
 0x9b9   : > { %p2270_p2 = pnand %p3099_p12, %p3098_p9 }
 0x9bb   : > { %2483 = dma.done.wait (!%p2270_p2), %s1910_s0, 128  }
 0x9bc   : > { %2485 = vsyncadd (!%p2270_p2), %s1910_s0, 4294967168  ;;  %p32_p13 = scmp.ge.s32.totalorder %s2722_s16, 4   ;;  %s3100_s27 = smov %s2492_s28 }
 0x9bd   : > { %s3101_s28 = smov %s2496_s29  ;;  %s3102_s29 = smov %s2738_s26 }
 0x9be   : > { %s3103_s30 = smov %s2722_s16  ;;  %34 = sbr.rel (!%p32_p13) target bundleno = 18 (0x12), region = 148 }
 0x9c5   :  { %1915 = vsyncpa [#allocation3], 1 }
 0x9c6   :  { %1917 = vsyncpa [#allocation3 + $0x1], 1 }
 0x9c7   :  { %1918 = vsyncpa [#allocation6], 1 }
 0x9c8   :  { %1919 = vsyncpa [#allocation4], 1 }
 0x9c9   :  { %1921 = vsyncpa [#allocation4 + $0x1], 1 }

</bundles_post_ra>
